<compile_context>
chip_gen: v5e
topology: v5e:2x2
jax: 0.10.0
libtpu: 0.0.40
codegen_flags: <defaults>
</compile_context>

<pallas_src>
import jax
import jax.numpy as jnp
from jax.experimental import pallas as pl
from jax.experimental.pallas import tpu as pltpu


_SUBLANE = 8  # second-to-last-dim granularity for f32


def _round_up(n, m):
    return ((n + m - 1) // m) * m


def _mlp_kernel(x_ref, w1_ref, b1_ref, w2_ref, b2_ref, o_ref):
    # One batch tile: two MXU matmuls (f32 accumulation), bias + ReLU on VPU.
    x = x_ref[...]                                                  # (tile_b, F)
    h = jnp.dot(x, w1_ref[...], preferred_element_type=jnp.float32) # (tile_b, H)
    h = jnp.maximum(h + b1_ref[...], 0.0)                           # (1,H) broadcasts
    y = jnp.dot(h, w2_ref[...], preferred_element_type=jnp.float32) # (tile_b, O)
    o_ref[...] = (y + b2_ref[...]).astype(o_ref.dtype)


def motion_predict_pallas(x, w1, b1, w2, b2, *, tile_b=2048):
    """y = relu(x @ w1 + b1) @ w2 + b2.

    x: (B, F); w1: (F, H); b1: (H,); w2: (H, O); b2: (O,).
    Weights are stored pre-transposed as (in, out) relative to torch.nn.Linear.
    """
    B, F = x.shape
    H = w1.shape[1]
    O = w2.shape[1]

    # ---- Batch tiling only. F/H/O stay unpadded: blocks spanning the full
    # last dim are exempt from the (8,128) rule, and padding them would only
    # inflate HBM traffic on this memory-bound kernel.
    Bp = _round_up(max(B, _SUBLANE), _SUBLANE)

    # Guarantee >=2 grid steps when the batch allows it so the "parallel"
    # batch axis can shard across v7x's two TensorCores (neutral on v5e/v6e).
    if Bp >= 2 * _SUBLANE:
        tile_b = min(tile_b, _round_up(pl.cdiv(Bp, 2), _SUBLANE))
    tile_b = min(tile_b, Bp)
    Bp = _round_up(Bp, tile_b)

    needs_batch_pad = Bp != B
    xp = jnp.pad(x, ((0, Bp - B), (0, 0))) if needs_batch_pad else x

    b1r = b1.reshape(1, H)
    b2r = b2.reshape(1, O)

    grid = (Bp // tile_b,)

    # Unpadded (true) cost so XLA schedules neighbors against the real footprint.
    cost = pl.CostEstimate(
        flops=2 * B * (F * H + H * O),
        transcendentals=0,
        bytes_accessed=4 * (B * F + F * H + H + H * O + O + B * O),
    )

    out = pl.pallas_call(
        _mlp_kernel,
        out_shape=jax.ShapeDtypeStruct((Bp, O), jnp.float32),
        grid=grid,
        in_specs=[
            pl.BlockSpec((tile_b, F), lambda i: (i, 0)),  # x: streamed per batch tile
            pl.BlockSpec((F, H), lambda i: (0, 0)),       # weights/biases: VMEM-resident
            pl.BlockSpec((1, H), lambda i: (0, 0)),
            pl.BlockSpec((H, O), lambda i: (0, 0)),
            pl.BlockSpec((1, O), lambda i: (0, 0)),
        ],
        out_specs=pl.BlockSpec((tile_b, O), lambda i: (i, 0)),
        compiler_params=pltpu.CompilerParams(
            dimension_semantics=("parallel",)),
        cost_estimate=cost,
    )(xp, w1, b1r, w2, b2r)

    return out[:B] if needs_batch_pad else out


def motion_predict_ref(x, w1, b1, w2, b2):
    # Pure-JAX reference mirroring the PyTorch forward.
    h = jnp.maximum(x @ w1 + b1, 0.0)
    return h @ w2 + b2


if __name__ == "__main__":
    # Shapes consistent with the module: n_feature=32, n_hidden=32, n_output=8.
    B, F, H, O = 8, 32, 32, 8

    key = jax.random.PRNGKey(0)
    kx, kw1, kb1, kw2, kb2 = jax.random.split(key, 5)

    x = jax.random.normal(kx, (B, F), dtype=jnp.float32)
    w1 = jax.random.uniform(kw1, (F, H), jnp.float32, -1.0 / F**0.5, 1.0 / F**0.5)
    b1 = jax.random.uniform(kb1, (H,), jnp.float32, -1.0 / F**0.5, 1.0 / F**0.5)
    w2 = jax.random.uniform(kw2, (H, O), jnp.float32, -1.0 / H**0.5, 1.0 / H**0.5)
    b2 = jax.random.uniform(kb2, (O,), jnp.float32, -1.0 / H**0.5, 1.0 / H**0.5)

    # Small-batch check (single grid step, no padding emitted).
    out = motion_predict_pallas(x, w1, b1, w2, b2)
    jax.block_until_ready(out)
    ref = motion_predict_ref(x, w1, b1, w2, b2)
    assert out.shape == (B, O)
    assert jnp.allclose(out, ref, atol=1e-5, rtol=1e-5)

    # Multi-step grid check (exercises the pipelined, 2-TensorCore-shardable path).
    B2 = 64
    x2 = jax.random.normal(kx, (B2, F), dtype=jnp.float32)
    out2 = motion_predict_pallas(x2, w1, b1, w2, b2)
    jax.block_until_ready(out2)
    ref2 = motion_predict_ref(x2, w1, b1, w2, b2)
    assert out2.shape == (B2, O)
    assert jnp.allclose(out2, ref2, atol=1e-5, rtol=1e-5)

    print("KERNEL_OK")
</pallas_src>

<mosaic_0001>
module attributes {stable_mosaic.version = 11 : i64} {
  func.func @_mlp_kernel(%arg0: i32, %arg1: memref<8x32xf32, #tpu.memory_space<vmem>>, %arg2: memref<32x32xf32, #tpu.memory_space<vmem>>, %arg3: memref<1x32xf32, #tpu.memory_space<vmem>>, %arg4: memref<32x8xf32, #tpu.memory_space<vmem>>, %arg5: memref<1x8xf32, #tpu.memory_space<vmem>>, %arg6: memref<8x8xf32, #tpu.memory_space<vmem>>) attributes {dimension_semantics = [#tpu.dimension_semantics<parallel>], iteration_bounds = array<i64: 1>, scalar_prefetch = 0 : i64, scratch_operands = 0 : i64, tpu.core_type = #tpu.core_type<tc>, window_params = [{transform_indices = @transform_0, window_bounds = array<i64: 8, 32>}, {pipeline_mode = #tpu.pipeline_mode<synchronous>, transform_indices = @transform_1, window_bounds = array<i64: 32, 32>}, {pipeline_mode = #tpu.pipeline_mode<synchronous>, transform_indices = @transform_2, window_bounds = array<i64: 1, 32>}, {pipeline_mode = #tpu.pipeline_mode<synchronous>, transform_indices = @transform_3, window_bounds = array<i64: 32, 8>}, {pipeline_mode = #tpu.pipeline_mode<synchronous>, transform_indices = @transform_4, window_bounds = array<i64: 1, 8>}, {transform_indices = @transform_5, window_bounds = array<i64: 8, 8>}]} {
    %c0 = arith.constant 0 : index
    %c0_0 = arith.constant 0 : index
    %0 = vector.load %arg1[%c0, %c0_0] : memref<8x32xf32, #tpu.memory_space<vmem>>, vector<8x32xf32>
    %c0_1 = arith.constant 0 : index
    %c0_2 = arith.constant 0 : index
    %1 = vector.load %arg2[%c0_1, %c0_2] : memref<32x32xf32, #tpu.memory_space<vmem>>, vector<32x32xf32>
    %cst = arith.constant dense<0.000000e+00> : vector<8x32xf32>
    %2 = tpu.matmul %0, %1, %cst {dimension_numbers = #tpu.dot_dimension_numbers<[1], [0], [0], [1], [0, 0, 1, 1], [], []>} : vector<8x32xf32>, vector<32x32xf32>, vector<8x32xf32> -> vector<8x32xf32>
    %c0_3 = arith.constant 0 : index
    %c0_4 = arith.constant 0 : index
    %3 = vector.load %arg3[%c0_3, %c0_4] : memref<1x32xf32, #tpu.memory_space<vmem>>, vector<1x32xf32>
    %4 = vector.broadcast %3 : vector<1x32xf32> to vector<8x32xf32>
    %5 = arith.addf %2, %4 : vector<8x32xf32>
    %cst_5 = arith.constant 0.000000e+00 : f32
    %6 = vector.broadcast %cst_5 : f32 to vector<8x32xf32>
    %7 = arith.maximumf %5, %6 : vector<8x32xf32>
    %c0_6 = arith.constant 0 : index
    %c0_7 = arith.constant 0 : index
    %8 = vector.load %arg4[%c0_6, %c0_7] : memref<32x8xf32, #tpu.memory_space<vmem>>, vector<32x8xf32>
    %cst_8 = arith.constant dense<0.000000e+00> : vector<8x8xf32>
    %9 = tpu.matmul %7, %8, %cst_8 {dimension_numbers = #tpu.dot_dimension_numbers<[1], [0], [0], [1], [0, 0, 1, 1], [], []>} : vector<8x32xf32>, vector<32x8xf32>, vector<8x8xf32> -> vector<8x8xf32>
    %c0_9 = arith.constant 0 : index
    %c0_10 = arith.constant 0 : index
    %10 = vector.load %arg5[%c0_9, %c0_10] : memref<1x8xf32, #tpu.memory_space<vmem>>, vector<1x8xf32>
    %11 = vector.broadcast %10 : vector<1x8xf32> to vector<8x8xf32>
    %12 = arith.addf %9, %11 : vector<8x8xf32>
    %c0_11 = arith.constant 0 : index
    %c0_12 = arith.constant 0 : index
    %13 = vector.load %arg6[%c0_11, %c0_12] : memref<8x8xf32, #tpu.memory_space<vmem>>, vector<8x8xf32>
    tpu.vector_store %arg6[%c0_11, %c0_12], %12 {strides = array<i32>} : memref<8x8xf32, #tpu.memory_space<vmem>>, vector<8x8xf32>,
    return
  }
  func.func @transform_0(%arg0: i32) -> (i32, i32) {
    %c0_i32 = arith.constant 0 : i32
    %c0_i32_0 = arith.constant 0 : i32
    return %arg0, %c0_i32 : i32, i32
  }
  func.func @transform_1(%arg0: i32) -> (i32, i32) {
    %c0_i32 = arith.constant 0 : i32
    %c0_i32_0 = arith.constant 0 : i32
    %c0_i32_1 = arith.constant 0 : i32
    return %c0_i32, %c0_i32_0 : i32, i32
  }
  func.func @transform_2(%arg0: i32) -> (i32, i32) {
    %c0_i32 = arith.constant 0 : i32
    %c0_i32_0 = arith.constant 0 : i32
    %c0_i32_1 = arith.constant 0 : i32
    return %c0_i32, %c0_i32_0 : i32, i32
  }
  func.func @transform_3(%arg0: i32) -> (i32, i32) {
    %c0_i32 = arith.constant 0 : i32
    %c0_i32_0 = arith.constant 0 : i32
    %c0_i32_1 = arith.constant 0 : i32
    return %c0_i32, %c0_i32_0 : i32, i32
  }
  func.func @transform_4(%arg0: i32) -> (i32, i32) {
    %c0_i32 = arith.constant 0 : i32
    %c0_i32_0 = arith.constant 0 : i32
    %c0_i32_1 = arith.constant 0 : i32
    return %c0_i32, %c0_i32_0 : i32, i32
  }
  func.func @transform_5(%arg0: i32) -> (i32, i32) {
    %c0_i32 = arith.constant 0 : i32
    %c0_i32_0 = arith.constant 0 : i32
    return %arg0, %c0_i32 : i32, i32
  }
}

</mosaic_0001>

<bundles_post_ra>
// kernel: tpu_custom_call.1
= control target key start
LH: loop header
LB: loop body
LE: loop exit
PB: predicated region body
PF: predicated region fallthrough
CT: control target
= control target key end

     0   :  { %s202_s0 = inlined_call_operand.vmem [shape: f32[8,32], index: 0, kind: input, shape index: {}]   ;;  %s203_s1 = inlined_call_operand.vmem [shape: f32[32,32], index: 1, kind: input, shape index: {}]   ;;  %s204_s2 = inlined_call_operand.vmem [shape: f32[1,32], index: 2, kind: input, shape index: {}]   ;;  %s205_s3 = inlined_call_operand.vmem [shape: f32[32,8], index: 3, kind: input, shape index: {}]   ;;  %s206_s4 = inlined_call_operand.vmem [shape: f32[1,8], index: 4, kind: input, shape index: {}]   ;;  %s207_s5 = inlined_call_operand.hbm [shape: f32[8,8], index: 5, kind: output, shape index: {}]  }
   0x1   :  { %v25_v0 = vld [vmem:[%s203_s1 + $0x18] sm:$0xff]  ;;  %v24_v1 = vld [vmem:[%s203_s1 + $0x10] sm:$0xff]  ;;  %v23_v3 = vld [vmem:[%s203_s1 + $0x8] sm:$0xff] }
   0x2   :  { %46 = vmatpush.msra.mxu0 %v25_v0  ;;  %v58_v2 = vld [vmem:[%s205_s3 + $0x18] sm:$0xff] }
   0x3   :  { %78 = vmatpush.msra.mxu1 %v58_v2 }
   0x4   :  { %47 = vmatpush.msra.mxu0 %v24_v1 }
   0x5   :  { %10 = vsyncpa [#allocation3], 0  ;;  %v22_v4 = vld [vmem:[%s203_s1] sm:$0xff]  ;;  %vm30_vm0 = vcmask 261120   ;;  %v57_v6 = vld [vmem:[%s205_s3 + $0x10] sm:$0xff]  ;;  %s135_s13 = smov [#allocation2]  }
   0x6   :  { %48 = vmatpush.msra.mxu0 %v23_v3  ;;  %v21_v5 = vld [vmem:[%s202_s0] sm:$0xff]  ;;  %79 = vmatpush.msra.mxu1 %v57_v6  ;;  %v56_v7 = vld [vmem:[%s205_s3 + $0x8] sm:$0xff]  ;;  %s93_s14 = sshll.u32 %s135_s13, 4  ;;  %s95_s17 = sshll.u32 %s207_s5, 4  ;;  %vm86_vm1 = vcmask 64512   ;;  %s94_s14 = int_to_ptr.vmem [resolvable:$true] %s93_s14  ;;  %s96_s17 = int_to_ptr.hbm [resolvable:$true] %s95_s17 }
   0x7   :  { %v55_v8 = vld [vmem:[%s205_s3] sm:$0xff] }
   0x8   :  { %49 = vmatpush.msra.mxu0 %v22_v4  ;;  %80 = vmatpush.msra.mxu1 %v56_v7  ;;  %v107_v9 = vld [vmem:[%s204_s2] ss:$0 sm:$0xff] }
   0x9   :  { %104 = vmatmul.msk.f32.vlgmr.msra.gmra.mxu0 %vm30_vm0, %v21_v5  ;;  %v108_v13 = vld [vmem:[%s206_s4] ss:$0 sm:$0xff] }
   0xa   :  { %81 = vmatpush.msra.mxu1 %v55_v8 }
  0x86   :  { %v51_v10 = vpop.f32.mrf.mxu0 }
  0x87   :  { %v52_v11 = vadd.f32 %v107_v9, %v51_v10 }
  0x89   :  { %v54_v12 = vmax.f32 %v52_v11, 0.0 }
  0x8b   :  { %105 = vmatmul.msk.f32.vlgmr.msra.gmra.mxu1 %vm30_vm0, %v54_v12 }
 0x108   :  { %v83_v14 = vpop.f32.mrf.mxu1 }
 0x109   :  { %v84_v15 = vadd.f32 %v108_v13, %v83_v14 }
 0x10b   :  { %87 = vst.msk [vmem:[#allocation2] sm:$0xff] %vm86_vm1, %v84_v15 }
 0x10c   :  { %98 = dma.vmem_to_hbm [thread:$0]  %s94_s14, 128, %s96_s17, [#allocation3]  }
 0x10d   :  { %133 = dma.done.wait [#allocation3], 128  }
 0x10e   :  { %134 = vsyncadd [#allocation3], 4294967168 }
 0x10f   :  { %103 = vsyncpa [#allocation3], 1 }

</bundles_post_ra>
